<compile_context>
chip_gen: v7x
topology: tpu7x:2x2x1
jax: 0.10.0
libtpu: 0.0.40
codegen_flags: <defaults>
</compile_context>

<pallas_src>
import math

import jax
import jax.numpy as jnp
from jax import lax
from jax.experimental import pallas as pl
from jax.experimental.pallas import tpu as pltpu

_GELU_C = math.sqrt(2.0 / math.pi)


def _round_up(x, m):
    return ((x + m - 1) // m) * m


def _sublane_multiple(dtype):
    isz = jnp.dtype(dtype).itemsize
    if isz >= 4:
        return 8
    if isz == 2:
        return 16
    return 32


def _vmem_capacity_bytes():
    try:
        info = pltpu.get_tpu_info()
        cap = int(getattr(info, "vmem_capacity_bytes", 0) or 0)
        if cap > 0:
            return cap
    except Exception:
        pass
    return 64 * 1024 * 1024  # conservative default (v7x per-TensorCore)


def _mlp_tile_bytes(tm, ti, H, itemsize, io_buffers=1):
    return (
        io_buffers * tm * H * itemsize      # x tile
        + io_buffers * tm * H * itemsize    # out tile
        + 2 * ti * H * itemsize             # w1 slab (double-buffered)
        + 2 * ti * H * itemsize             # w2 slab (double-buffered)
        + 2 * ti * itemsize                 # b1 slab
        + 2 * H * itemsize                  # b2
        + tm * H * 4                        # f32 accumulator scratch
        + 2 * tm * ti * 4                   # f32 intermediate activations
    )


def _select_tiles(M, H, I, itemsize, vmem_cap, sub, tm_req, ti_req):
    budget = int(vmem_cap * 0.75)           # leave headroom for compiler scratch
    m_cap = _round_up(M, sub)

    if vmem_cap >= 96 * 1024 * 1024:         # v5e / v6e class (128 MiB VMEM)
        tm_cands = [1024, 768, 512, 384, 256, 128]
        ti_cands = [512, 256, 128]
    else:                                     # v7x class (64 MiB per TensorCore)
        tm_cands = [512, 384, 256, 128]
        ti_cands = [256, 128]

    if tm_req is not None:
        tm_cands = [tm_req]
    if ti_req is not None:
        ti_cands = [ti_req]

    def fit_ti(ti_c):
        if ti_c >= I:
            return I
        assert ti_c % 128 == 0, "ti must be a multiple of 128 when tiling I"
        return ti_c

    chosen = None
    for tm_c in tm_cands:                     # prefer largest tm (roofline)
        tm_c = max(sub, min(_round_up(tm_c, sub), m_cap))
        for ti_c in ti_cands:                 # then largest ti that still fits
            ti_c = fit_ti(ti_c)
            if _mlp_tile_bytes(tm_c, ti_c, H, itemsize) <= budget:
                chosen = (tm_c, ti_c)
                break
        if chosen is not None:
            break
    if chosen is None:                        # nothing fits headroom: smallest
        tm_c = max(sub, min(_round_up(tm_cands[-1], sub), m_cap))
        chosen = (tm_c, fit_ti(ti_cands[-1]))

    tm_eff, ti_eff = chosen
    # Guarantee >= 2 token tiles so the "parallel" grid axis can occupy both
    # TensorCores on multi-TC chips (v7x); no-op cost on 1-TC chips.
    if M > sub and _round_up(M, tm_eff) // tm_eff < 2:
        tm_eff = max(sub, _round_up(pl.cdiv(M, 2), sub))
    return tm_eff, ti_eff


def _fused_mlp_kernel(x_ref, w1_ref, b1_ref, w2_ref, b2_ref, o_ref, acc_ref):
    # x_ref:  (tm, H)   token tile, native operand dtype
    # w1_ref: (ti, H)   fc1 weight slab in PyTorch (I, H) layout (contiguous DMA)
    # b1_ref: (1, ti)
    # w2_ref: (ti, H)   fc2 weight slab, pre-transposed once at load time
    # b2_ref: (1, H)
    # o_ref:  (tm, H)
    # acc_ref:(tm, H)   f32 accumulator, resident across the I (j) axis
    j = pl.program_id(1)

    @pl.when(j == 0)
    def _init():
        acc_ref[...] = jnp.zeros_like(acc_ref)

    # fc1 as an NT matmul on the MXU (contract shared H axis); native-dtype
    # operands, f32 accumulation.
    h = lax.dot_general(
        x_ref[...], w1_ref[...],
        dimension_numbers=(((1,), (1,)), ((), ())),
        preferred_element_type=jnp.float32,
    )
    h = h + b1_ref[...].astype(jnp.float32)

    # tanh-approximated GELU (matches FusedMLPGeluTanh._forward_pytorch), f32
    g = 0.5 * h * (1.0 + jnp.tanh(_GELU_C * (h + 0.044715 * (h * h * h))))

    # fc2 partial product for this I-slab, accumulated in f32
    acc_ref[...] += jnp.dot(
        g.astype(w2_ref.dtype), w2_ref[...], preferred_element_type=jnp.float32
    )

    @pl.when(j == pl.num_programs(1) - 1)
    def _finalize():
        o_ref[...] = (acc_ref[...] + b2_ref[...].astype(jnp.float32)).astype(o_ref.dtype)


def prepare_fused_mlp_weights(w1, b1, w2, b2):
    """One-time (load-time) weight prep from PyTorch nn.Linear layout.

    w1: [I, H]  kept as-is (kernel does an NT matmul → contiguous (ti, H) slabs)
    w2: [H, I]  transposed once to [I, H] (contiguous (ti, H) slabs)
    """
    return jnp.asarray(w1), jnp.asarray(b1), jnp.asarray(w2).T, jnp.asarray(b2)


def fused_transformer_mlp(hidden_states, w1, b1, w2_t, b2, *,
                          tm=None, ti=None, use_bf16_operands=False):
    """Fused MLP: fc2(gelu_tanh(fc1(x))).

    hidden_states: [B, S, H]
    w1:   [I, H]  fc1 weight (PyTorch layout, unchanged)
    b1:   [I]
    w2_t: [I, H]  fc2 weight transposed once at load time (PyTorch is [H, I])
    b2:   [H]
    Returns [B, S, H] in the input dtype.
    """
    B, S, H = hidden_states.shape
    I, Hw = w1.shape
    assert Hw == H and w2_t.shape == (I, H) and b1.shape == (I,) and b2.shape == (H,)
    out_dtype = hidden_states.dtype

    M = B * S
    x2d = hidden_states.reshape(M, H)

    # Optional opt-in bf16-operand path (f32 accumulation / f32 GELU preserved).
    if use_bf16_operands and out_dtype == jnp.float32:
        x2d = x2d.astype(jnp.bfloat16)
        w1 = w1.astype(jnp.bfloat16)
        w2_t = w2_t.astype(jnp.bfloat16)
    op_dtype = x2d.dtype
    itemsize = jnp.dtype(op_dtype).itemsize
    sub = _sublane_multiple(op_dtype)

    vmem_cap = _vmem_capacity_bytes()
    tm_eff, ti_eff = _select_tiles(M, H, I, itemsize, vmem_cap, sub, tm, ti)

    # --- token tiling (pad ragged M; no divisibility assert) ---
    M_pad = _round_up(M, tm_eff)
    if M_pad != M:
        x2d = jnp.pad(x2d, ((0, M_pad - M), (0, 0)))

    # --- intermediate (reduction) tiling; zero-padded I contributes exactly 0 ---
    I_pad = I if ti_eff == I else _round_up(I, ti_eff)
    if I_pad != I:
        w1 = jnp.pad(w1, ((0, I_pad - I), (0, 0)))
        b1 = jnp.pad(b1, (0, I_pad - I))
        w2_t = jnp.pad(w2_t, ((0, I_pad - I), (0, 0)))

    b1_r = b1.reshape(1, I_pad)
    b2_r = b2.reshape(1, H)

    grid = (M_pad // tm_eff, I_pad // ti_eff)

    def build(buffered_io):
        io_buffers = 1 if buffered_io else 2
        io_kwargs = {"pipeline_mode": pl.Buffered(1)} if buffered_io else {}
        tile_bytes = _mlp_tile_bytes(tm_eff, ti_eff, H, itemsize, io_buffers)
        # ~25% headroom for compiler-internal scratch/semaphores; capped at the
        # queried physical VMEM (not hard-coded).
        vmem_limit = int(min(max(int(tile_bytes * 1.25), 16 * 1024 * 1024), vmem_cap))
        return pl.pallas_call(
            _fused_mlp_kernel,
            out_shape=jax.ShapeDtypeStruct((M_pad, H), out_dtype),
            grid=grid,
            in_specs=[
                pl.BlockSpec((tm_eff, H), lambda i, j: (i, 0), **io_kwargs),  # x tile
                pl.BlockSpec((ti_eff, H), lambda i, j: (j, 0)),               # w1 slab
                pl.BlockSpec((1, ti_eff), lambda i, j: (0, j)),               # b1 slab
                pl.BlockSpec((ti_eff, H), lambda i, j: (j, 0)),               # w2^T slab
                pl.BlockSpec((1, H), lambda i, j: (0, 0)),                    # b2
            ],
            out_specs=pl.BlockSpec((tm_eff, H), lambda i, j: (i, 0), **io_kwargs),
            scratch_shapes=[pltpu.VMEM((tm_eff, H), jnp.float32)],
            compiler_params=pltpu.CompilerParams(
                dimension_semantics=("parallel", "arbitrary"),
                vmem_limit_bytes=vmem_limit,
            ),
        )

    try:
        # x / out are j-invariant → single-buffer them (frees VMEM for larger tm).
        out2d = build(True)(x2d, w1, b1_r, w2_t, b2_r)
    except Exception:
        # Fallback if Buffered(1) on in/out specs is rejected by this JAX build.
        out2d = build(False)(x2d, w1, b1_r, w2_t, b2_r)

    return out2d[:M].reshape(B, S, H)


if __name__ == "__main__":
    # Small, module-consistent shapes: [batch, seq, hidden], intermediate = 4*hidden
    batch, seq, hidden, intermediate = 2, 8, 64, 256

    key = jax.random.PRNGKey(0)
    kx, k1, kb1, k2, kb2 = jax.random.split(key, 5)

    x = jax.random.normal(kx, (batch, seq, hidden), dtype=jnp.float32)

    # deterministic parameter init in PyTorch nn.Linear layout
    bound1 = 1.0 / (hidden ** 0.5)
    w1 = jax.random.uniform(k1, (intermediate, hidden), jnp.float32, -bound1, bound1)
    b1 = jax.random.uniform(kb1, (intermediate,), jnp.float32, -bound1, bound1)
    bound2 = 1.0 / (intermediate ** 0.5)
    w2 = jax.random.uniform(k2, (hidden, intermediate), jnp.float32, -bound2, bound2)
    b2 = jax.random.uniform(kb2, (hidden,), jnp.float32, -bound2, bound2)

    # one-time weight prep (load-time, outside the per-call path)
    w1_k, b1_k, w2t_k, b2_k = prepare_fused_mlp_weights(w1, b1, w2, b2)

    # ti=128 so this small test exercises the I-reduction/accumulator path;
    # tm is auto-selected (and split so the parallel axis has >= 2 tiles).
    out = fused_transformer_mlp(x, w1_k, b1_k, w2t_k, b2_k, ti=128)
    out = jax.block_until_ready(out)

    # pure-JAX reference (tanh-approx GELU MLP, FusedMLPGeluTanh._forward_pytorch)
    h = x @ w1.T + b1
    h = 0.5 * h * (1.0 + jnp.tanh(_GELU_C * (h + 0.044715 * h ** 3)))
    ref = h @ w2.T + b2
    max_err = float(jnp.max(jnp.abs(out - ref)))
    assert jnp.allclose(out, ref, atol=2e-4, rtol=2e-4), f"mismatch vs reference (max abs err {max_err})"

    # TODO(synk): relu / silu / swiglu activation variants and dropout_prob > 0
    # are not implemented; default FusedTransformerMLP path is gelu-tanh, dropout 0.

    print("KERNEL_OK")
</pallas_src>

<mosaic_0001>
module attributes {stable_mosaic.version = 11 : i64} {
  func.func @_fused_mlp_kernel(%arg0: i32, %arg1: i32, %arg2: memref<8x64xf32, #tpu.memory_space<vmem>>, %arg3: memref<128x64xf32, #tpu.memory_space<vmem>>, %arg4: memref<1x128xf32, #tpu.memory_space<vmem>>, %arg5: memref<128x64xf32, #tpu.memory_space<vmem>>, %arg6: memref<1x64xf32, #tpu.memory_space<vmem>>, %arg7: memref<8x64xf32, #tpu.memory_space<vmem>>, %arg8: memref<8x64xf32, #tpu.memory_space<vmem>>) attributes {dimension_semantics = [#tpu.dimension_semantics<parallel>, #tpu.dimension_semantics<arbitrary>], iteration_bounds = array<i64: 2, 2>, scalar_prefetch = 0 : i64, scratch_operands = 1 : i64, tpu.core_type = #tpu.core_type<tc>, window_params = [{pipeline_mode = #tpu.pipeline_mode<synchronous>, transform_indices = @transform_0, window_bounds = array<i64: 8, 64>}, {transform_indices = @transform_1, window_bounds = array<i64: 128, 64>}, {transform_indices = @transform_2, window_bounds = array<i64: 1, 128>}, {transform_indices = @transform_3, window_bounds = array<i64: 128, 64>}, {pipeline_mode = #tpu.pipeline_mode<synchronous>, transform_indices = @transform_4, window_bounds = array<i64: 1, 64>}, {pipeline_mode = #tpu.pipeline_mode<synchronous>, transform_indices = @transform_5, window_bounds = array<i64: 8, 64>}]} {
    %c0_i32 = arith.constant 0 : i32
    %0 = arith.cmpi eq, %arg1, %c0_i32 : i32
    %1 = arith.extui %0 : i1 to i32
    %c0_i32_0 = arith.constant 0 : i32
    %2 = arith.cmpi ne, %1, %c0_i32_0 : i32
    scf.if %2 {
      %cst_18 = arith.constant 0.000000e+00 : f32
      %30 = vector.broadcast %cst_18 : f32 to vector<8x64xf32>
      %c0_19 = arith.constant 0 : index
      %c0_20 = arith.constant 0 : index
      %31 = vector.load %arg8[%c0_19, %c0_20] : memref<8x64xf32, #tpu.memory_space<vmem>>, vector<8x64xf32>
      tpu.vector_store %arg8[%c0_19, %c0_20], %30 {strides = array<i32>} : memref<8x64xf32, #tpu.memory_space<vmem>>, vector<8x64xf32>,
    } else {
    }
    %c0 = arith.constant 0 : index
    %c0_1 = arith.constant 0 : index
    %3 = vector.load %arg2[%c0, %c0_1] : memref<8x64xf32, #tpu.memory_space<vmem>>, vector<8x64xf32>
    %c0_2 = arith.constant 0 : index
    %c0_3 = arith.constant 0 : index
    %4 = vector.load %arg3[%c0_2, %c0_3] : memref<128x64xf32, #tpu.memory_space<vmem>>, vector<128x64xf32>
    %cst = arith.constant dense<0.000000e+00> : vector<8x128xf32>
    %5 = tpu.matmul %3, %4, %cst {dimension_numbers = #tpu.dot_dimension_numbers<[1], [1], [0], [0], [0, 0, 1, 0], [], []>} : vector<8x64xf32>, vector<128x64xf32>, vector<8x128xf32> -> vector<8x128xf32>
    %c0_4 = arith.constant 0 : index
    %c0_5 = arith.constant 0 : index
    %6 = vector.load %arg4[%c0_4, %c0_5] : memref<1x128xf32, #tpu.memory_space<vmem>>, vector<1x128xf32>
    %7 = vector.broadcast %6 : vector<1x128xf32> to vector<8x128xf32>
    %8 = arith.addf %5, %7 : vector<8x128xf32>
    %cst_6 = arith.constant 5.000000e-01 : f32
    %9 = vector.broadcast %cst_6 : f32 to vector<8x128xf32>
    %10 = arith.mulf %9, %8 : vector<8x128xf32>
    %11 = arith.mulf %8, %8 : vector<8x128xf32>
    %12 = arith.mulf %11, %8 : vector<8x128xf32>
    %cst_7 = arith.constant 4.471500e-02 : f32
    %13 = vector.broadcast %cst_7 : f32 to vector<8x128xf32>
    %14 = arith.mulf %13, %12 : vector<8x128xf32>
    %15 = arith.addf %8, %14 : vector<8x128xf32>
    %cst_8 = arith.constant 0.797884583 : f32
    %16 = vector.broadcast %cst_8 : f32 to vector<8x128xf32>
    %17 = arith.mulf %16, %15 : vector<8x128xf32>
    %18 = math.tanh %17 : vector<8x128xf32>
    %cst_9 = arith.constant 1.000000e+00 : f32
    %19 = vector.broadcast %cst_9 : f32 to vector<8x128xf32>
    %20 = arith.addf %19, %18 : vector<8x128xf32>
    %21 = arith.mulf %10, %20 : vector<8x128xf32>
    %c0_10 = arith.constant 0 : index
    %c0_11 = arith.constant 0 : index
    %22 = vector.load %arg8[%c0_10, %c0_11] : memref<8x64xf32, #tpu.memory_space<vmem>>, vector<8x64xf32>
    %c0_12 = arith.constant 0 : index
    %c0_13 = arith.constant 0 : index
    %23 = vector.load %arg5[%c0_12, %c0_13] : memref<128x64xf32, #tpu.memory_space<vmem>>, vector<128x64xf32>
    %cst_14 = arith.constant dense<0.000000e+00> : vector<8x64xf32>
    %24 = tpu.matmul %21, %23, %cst_14 {dimension_numbers = #tpu.dot_dimension_numbers<[1], [0], [0], [1], [0, 0, 1, 1], [], []>} : vector<8x128xf32>, vector<128x64xf32>, vector<8x64xf32> -> vector<8x64xf32>
    %25 = arith.addf %22, %24 : vector<8x64xf32>
    %c0_15 = arith.constant 0 : index
    %c0_16 = arith.constant 0 : index
    %26 = vector.load %arg8[%c0_15, %c0_16] : memref<8x64xf32, #tpu.memory_space<vmem>>, vector<8x64xf32>
    tpu.vector_store %arg8[%c0_15, %c0_16], %25 {strides = array<i32>} : memref<8x64xf32, #tpu.memory_space<vmem>>, vector<8x64xf32>,
    %c1_i32 = arith.constant 1 : i32
    %27 = arith.cmpi eq, %arg1, %c1_i32 : i32
    %28 = arith.extui %27 : i1 to i32
    %c0_i32_17 = arith.constant 0 : i32
    %29 = arith.cmpi ne, %28, %c0_i32_17 : i32
    scf.if %29 {
      %c0_18 = arith.constant 0 : index
      %c0_19 = arith.constant 0 : index
      %30 = vector.load %arg8[%c0_18, %c0_19] : memref<8x64xf32, #tpu.memory_space<vmem>>, vector<8x64xf32>
      %c0_20 = arith.constant 0 : index
      %c0_21 = arith.constant 0 : index
      %31 = vector.load %arg6[%c0_20, %c0_21] : memref<1x64xf32, #tpu.memory_space<vmem>>, vector<1x64xf32>
      %32 = vector.broadcast %31 : vector<1x64xf32> to vector<8x64xf32>
      %33 = arith.addf %30, %32 : vector<8x64xf32>
      %c0_22 = arith.constant 0 : index
      %c0_23 = arith.constant 0 : index
      %34 = vector.load %arg7[%c0_22, %c0_23] : memref<8x64xf32, #tpu.memory_space<vmem>>, vector<8x64xf32>
      tpu.vector_store %arg7[%c0_22, %c0_23], %33 {strides = array<i32>} : memref<8x64xf32, #tpu.memory_space<vmem>>, vector<8x64xf32>,
    } else {
    }
    return
  }
  func.func @transform_0(%arg0: i32, %arg1: i32) -> (i32, i32) {
    %c0_i32 = arith.constant 0 : i32
    %c0_i32_0 = arith.constant 0 : i32
    return %arg0, %c0_i32 : i32, i32
  }
  func.func @transform_1(%arg0: i32, %arg1: i32) -> (i32, i32) {
    %c0_i32 = arith.constant 0 : i32
    %c0_i32_0 = arith.constant 0 : i32
    return %arg1, %c0_i32 : i32, i32
  }
  func.func @transform_2(%arg0: i32, %arg1: i32) -> (i32, i32) {
    %c0_i32 = arith.constant 0 : i32
    %c0_i32_0 = arith.constant 0 : i32
    return %c0_i32, %arg1 : i32, i32
  }
  func.func @transform_3(%arg0: i32, %arg1: i32) -> (i32, i32) {
    %c0_i32 = arith.constant 0 : i32
    %c0_i32_0 = arith.constant 0 : i32
    return %arg1, %c0_i32 : i32, i32
  }
  func.func @transform_4(%arg0: i32, %arg1: i32) -> (i32, i32) {
    %c0_i32 = arith.constant 0 : i32
    %c0_i32_0 = arith.constant 0 : i32
    %c0_i32_1 = arith.constant 0 : i32
    return %c0_i32, %c0_i32_0 : i32, i32
  }
  func.func @transform_5(%arg0: i32, %arg1: i32) -> (i32, i32) {
    %c0_i32 = arith.constant 0 : i32
    %c0_i32_0 = arith.constant 0 : i32
    return %arg0, %c0_i32 : i32, i32
  }
}

module attributes {stable_mosaic.version = 11 : i64} {
  func.func @_fused_mlp_kernel(%arg0: i32, %arg1: i32, %arg2: memref<8x64xf32, #tpu.memory_space<vmem>>, %arg3: memref<128x64xf32, #tpu.memory_space<vmem>>, %arg4: memref<1x128xf32, #tpu.memory_space<vmem>>, %arg5: memref<128x64xf32, #tpu.memory_space<vmem>>, %arg6: memref<1x64xf32, #tpu.memory_space<vmem>>, %arg7: memref<8x64xf32, #tpu.memory_space<vmem>>, %arg8: memref<8x64xf32, #tpu.memory_space<vmem>>) attributes {dimension_semantics = [#tpu.dimension_semantics<parallel>, #tpu.dimension_semantics<arbitrary>], iteration_bounds = array<i64: 2, 2>, scalar_prefetch = 0 : i64, scratch_operands = 1 : i64, tpu.core_type = #tpu.core_type<tc>, window_params = [{transform_indices = @transform_0, window_bounds = array<i64: 8, 64>}, {transform_indices = @transform_1, window_bounds = array<i64: 128, 64>}, {transform_indices = @transform_2, window_bounds = array<i64: 1, 128>}, {transform_indices = @transform_3, window_bounds = array<i64: 128, 64>}, {pipeline_mode = #tpu.pipeline_mode<synchronous>, transform_indices = @transform_4, window_bounds = array<i64: 1, 64>}, {transform_indices = @transform_5, window_bounds = array<i64: 8, 64>}]} {
    %c0_i32 = arith.constant 0 : i32
    %0 = arith.cmpi eq, %arg1, %c0_i32 : i32
    %1 = arith.extui %0 : i1 to i32
    %c0_i32_0 = arith.constant 0 : i32
    %2 = arith.cmpi ne, %1, %c0_i32_0 : i32
    scf.if %2 {
      %cst_18 = arith.constant 0.000000e+00 : f32
      %30 = vector.broadcast %cst_18 : f32 to vector<8x64xf32>
      %c0_19 = arith.constant 0 : index
      %c0_20 = arith.constant 0 : index
      %31 = vector.load %arg8[%c0_19, %c0_20] : memref<8x64xf32, #tpu.memory_space<vmem>>, vector<8x64xf32>
      tpu.vector_store %arg8[%c0_19, %c0_20], %30 {strides = array<i32>} : memref<8x64xf32, #tpu.memory_space<vmem>>, vector<8x64xf32>,
    } else {
    }
    %c0 = arith.constant 0 : index
    %c0_1 = arith.constant 0 : index
    %3 = vector.load %arg2[%c0, %c0_1] : memref<8x64xf32, #tpu.memory_space<vmem>>, vector<8x64xf32>
    %c0_2 = arith.constant 0 : index
    %c0_3 = arith.constant 0 : index
    %4 = vector.load %arg3[%c0_2, %c0_3] : memref<128x64xf32, #tpu.memory_space<vmem>>, vector<128x64xf32>
    %cst = arith.constant dense<0.000000e+00> : vector<8x128xf32>
    %5 = tpu.matmul %3, %4, %cst {dimension_numbers = #tpu.dot_dimension_numbers<[1], [1], [0], [0], [0, 0, 1, 0], [], []>} : vector<8x64xf32>, vector<128x64xf32>, vector<8x128xf32> -> vector<8x128xf32>
    %c0_4 = arith.constant 0 : index
    %c0_5 = arith.constant 0 : index
    %6 = vector.load %arg4[%c0_4, %c0_5] : memref<1x128xf32, #tpu.memory_space<vmem>>, vector<1x128xf32>
    %7 = vector.broadcast %6 : vector<1x128xf32> to vector<8x128xf32>
    %8 = arith.addf %5, %7 : vector<8x128xf32>
    %cst_6 = arith.constant 5.000000e-01 : f32
    %9 = vector.broadcast %cst_6 : f32 to vector<8x128xf32>
    %10 = arith.mulf %9, %8 : vector<8x128xf32>
    %11 = arith.mulf %8, %8 : vector<8x128xf32>
    %12 = arith.mulf %11, %8 : vector<8x128xf32>
    %cst_7 = arith.constant 4.471500e-02 : f32
    %13 = vector.broadcast %cst_7 : f32 to vector<8x128xf32>
    %14 = arith.mulf %13, %12 : vector<8x128xf32>
    %15 = arith.addf %8, %14 : vector<8x128xf32>
    %cst_8 = arith.constant 0.797884583 : f32
    %16 = vector.broadcast %cst_8 : f32 to vector<8x128xf32>
    %17 = arith.mulf %16, %15 : vector<8x128xf32>
    %18 = math.tanh %17 : vector<8x128xf32>
    %cst_9 = arith.constant 1.000000e+00 : f32
    %19 = vector.broadcast %cst_9 : f32 to vector<8x128xf32>
    %20 = arith.addf %19, %18 : vector<8x128xf32>
    %21 = arith.mulf %10, %20 : vector<8x128xf32>
    %c0_10 = arith.constant 0 : index
    %c0_11 = arith.constant 0 : index
    %22 = vector.load %arg8[%c0_10, %c0_11] : memref<8x64xf32, #tpu.memory_space<vmem>>, vector<8x64xf32>
    %c0_12 = arith.constant 0 : index
    %c0_13 = arith.constant 0 : index
    %23 = vector.load %arg5[%c0_12, %c0_13] : memref<128x64xf32, #tpu.memory_space<vmem>>, vector<128x64xf32>
    %cst_14 = arith.constant dense<0.000000e+00> : vector<8x64xf32>
    %24 = tpu.matmul %21, %23, %cst_14 {dimension_numbers = #tpu.dot_dimension_numbers<[1], [0], [0], [1], [0, 0, 1, 1], [], []>} : vector<8x128xf32>, vector<128x64xf32>, vector<8x64xf32> -> vector<8x64xf32>
    %25 = arith.addf %22, %24 : vector<8x64xf32>
    %c0_15 = arith.constant 0 : index
    %c0_16 = arith.constant 0 : index
    %26 = vector.load %arg8[%c0_15, %c0_16] : memref<8x64xf32, #tpu.memory_space<vmem>>, vector<8x64xf32>
    tpu.vector_store %arg8[%c0_15, %c0_16], %25 {strides = array<i32>} : memref<8x64xf32, #tpu.memory_space<vmem>>, vector<8x64xf32>,
    %c1_i32 = arith.constant 1 : i32
    %27 = arith.cmpi eq, %arg1, %c1_i32 : i32
    %28 = arith.extui %27 : i1 to i32
    %c0_i32_17 = arith.constant 0 : i32
    %29 = arith.cmpi ne, %28, %c0_i32_17 : i32
    scf.if %29 {
      %c0_18 = arith.constant 0 : index
      %c0_19 = arith.constant 0 : index
      %30 = vector.load %arg8[%c0_18, %c0_19] : memref<8x64xf32, #tpu.memory_space<vmem>>, vector<8x64xf32>
      %c0_20 = arith.constant 0 : index
      %c0_21 = arith.constant 0 : index
      %31 = vector.load %arg6[%c0_20, %c0_21] : memref<1x64xf32, #tpu.memory_space<vmem>>, vector<1x64xf32>
      %32 = vector.broadcast %31 : vector<1x64xf32> to vector<8x64xf32>
      %33 = arith.addf %30, %32 : vector<8x64xf32>
      %c0_22 = arith.constant 0 : index
      %c0_23 = arith.constant 0 : index
      %34 = vector.load %arg7[%c0_22, %c0_23] : memref<8x64xf32, #tpu.memory_space<vmem>>, vector<8x64xf32>
      tpu.vector_store %arg7[%c0_22, %c0_23], %33 {strides = array<i32>} : memref<8x64xf32, #tpu.memory_space<vmem>>, vector<8x64xf32>,
    } else {
    }
    return
  }
  func.func @transform_0(%arg0: i32, %arg1: i32) -> (i32, i32) {
    %c0_i32 = arith.constant 0 : i32
    %c0_i32_0 = arith.constant 0 : i32
    return %arg0, %c0_i32 : i32, i32
  }
  func.func @transform_1(%arg0: i32, %arg1: i32) -> (i32, i32) {
    %c0_i32 = arith.constant 0 : i32
    %c0_i32_0 = arith.constant 0 : i32
    return %arg1, %c0_i32 : i32, i32
  }
  func.func @transform_2(%arg0: i32, %arg1: i32) -> (i32, i32) {
    %c0_i32 = arith.constant 0 : i32
    %c0_i32_0 = arith.constant 0 : i32
    return %c0_i32, %arg1 : i32, i32
  }
  func.func @transform_3(%arg0: i32, %arg1: i32) -> (i32, i32) {
    %c0_i32 = arith.constant 0 : i32
    %c0_i32_0 = arith.constant 0 : i32
    return %arg1, %c0_i32 : i32, i32
  }
  func.func @transform_4(%arg0: i32, %arg1: i32) -> (i32, i32) {
    %c0_i32 = arith.constant 0 : i32
    %c0_i32_0 = arith.constant 0 : i32
    %c0_i32_1 = arith.constant 0 : i32
    return %c0_i32, %c0_i32_0 : i32, i32
  }
  func.func @transform_5(%arg0: i32, %arg1: i32) -> (i32, i32) {
    %c0_i32 = arith.constant 0 : i32
    %c0_i32_0 = arith.constant 0 : i32
    return %arg0, %c0_i32 : i32, i32
  }
}

</mosaic_0001>

<bundles_post_ra>
// kernel: tpu_custom_call.1
= control target key start
LH: loop header
LB: loop body
LE: loop exit
PB: predicated region body
PF: predicated region fallthrough
CT: control target
= control target key end

     0   :  { %10 = vsyncpa [#allocation4], 0  ;;  %s1026_s18 = smov 0   ;;  %s1028_s19 = smov 0   ;;  %s1231_s0 = inlined_call_operand.vmem [shape: f32[16,64], index: 0, kind: input, shape index: {}]   ;;  %s1232_s1 = inlined_call_operand.vmem [shape: f32[256,64], index: 1, kind: input, shape index: {}]   ;;  %s1233_s2 = inlined_call_operand.vmem [shape: f32[1,256], index: 2, kind: input, shape index: {}]   ;;  %s1234_s3 = inlined_call_operand.vmem [shape: f32[256,64], index: 3, kind: input, shape index: {}]   ;;  %s1235_s4 = inlined_call_operand.vmem [shape: f32[1,64], index: 4, kind: input, shape index: {}]   ;;  %s1236_s5 = inlined_call_operand.hbm [shape: f32[16,64], index: 5, kind: output, shape index: {}]  }
   0x1   :  { %s1030_s20 = smov 0   ;;  %s1032_s21 = smov 0  }
   0x2   :  { %s1034_s22 = smov 0   ;;  %s1036_s23 = smov 0  }
   0x3   :  { %s1038_s24 = smov 0  }
   0x4 LB: > { %s25_s25 = sadd.s32 1, %s981_s22  ;;  %s28_s26 = sadd.s32 1, %s985_s23  ;;  %s989_s24 = sphi %s1038_s24, %s16_s24   ;;  %s985_s23 = sphi %s1036_s23, %s1245_s23   ;;  %s981_s22 = sphi %s1034_s22, %s1244_s22   ;;  %s977_s21 = sphi %s1032_s21, %s1243_s21   ;;  %s973_s20 = sphi %s1030_s20, %s1242_s20   ;;  %s969_s19 = sphi %s1028_s19, %s1241_s19   ;;  %s965_s18 = sphi %s1026_s18, %s1240_s18  }
   0x5   : > { %p26_p0 = scmp.ge.s32.totalorder %s25_s25, 2  ;;  %s645_s27 = sadd.s32 4294967295, %s989_s24  }
   0x6   : > { %p170_p1 = scmp.ne.s32.totalorder %s969_s19, %s965_s18  ;;  %p171_p2 = scmp.eq.s32.totalorder %s645_s27, 3 }
   0x7   : > { %s1247_s25 = smov (%p26_p0, %s25_s25), 0  ;;  %s1249_s26 = smov (!%p26_p0, %s28_s26), %s985_s23 }
   0x8   : > { %p648_p3 = scmp.ge.s32.totalorder %s989_s24, 1  ;;  %p30_p4 = scmp.ge.s32.totalorder %s1249_s26, 2 }
   0x9   : > { %p229_p5 = scmp.lt.s32.totalorder %s989_s24, 5  ;;  %p1068_p6 = por %p171_p2, %p170_p1 }
   0xa   : > { %s1251_s26 = smov (%p30_p4, %s1249_s26), 0  ;;  %s160_s30 = sadd.s32 1, %s969_s19 }
   0xb   : > { %p230_p7 = pnand %p648_p3, %p229_p5  ;;  %s157_s29 = ssub.s32 %s985_s23, %s1251_s26 }
   0xc   : > { %p158_p8 = scmp.eq.s32.totalorder %s157_s29, 0  ;;  %p264_p9 = scmp.lt.s32.totalorder (!%p230_p7), %s977_s21, 1 }
   0xd   : > { %233 = sbr.rel (%p230_p7) target bundleno = 584 (0x248), region = 40  ;;  %s650_s7 = sshll.u32 (!%p230_p7), %s973_s20, 4 }
   0xe   : > { %s1078_s6 = scalar_select %p158_p8, %s969_s19, %s160_s30  }
   0xf   : > { %p269_p10 = scmp.lt.s32.totalorder (!%p230_p7), %s650_s7, 31  ;;  %p274_p11 = scmp.lt.s32.totalorder (!%p230_p7), %s973_s20, 1 }
  0x10   : > { %p654_p12 = scmp.ne.s32.totalorder (!%p230_p7), %s973_s20, 0 }
  0x14   : > { %s265_s8 = scalar_select %p264_p9, %s977_s21, 1 }
  0x15   : > { %s1253_s7 = smov (!%p269_p10, %s650_s7), 31  ;;  %286 = sbr.rel (%p654_p12) target bundleno = 28 (0x1c), region = 44 }
  0x16   : > { %s649_s9 = sshll.u32 %s265_s8, 3  ;;  %s651_s13 = sshll.u32 %s1253_s7, 3  ;;  %vm287_vm0 = vcmask (!%p654_p12), 523264   ;;  %v991_v0 = vmov (!%p654_p12), 0.0  }
  0x17   : > { %s1087_s12 = scalar_lea.vmem %s1231_s0, %s649_s9  ;;  %s1092_s16 = scalar_lea.vmem %s1232_s1, %s651_s13  ;;  %288 = vst.msk [vmem:[#allocation2] sm:$0xff] (!%p654_p12), %vm287_vm0, %v991_v0 }
  0x18   : > { %s1097_s27 = scalar_lea.vmem %s1234_s3, %s651_s13 }
  0x19   : > { %s1100_s29 = scalar_select %p274_p11, %s973_s20, 1 }
  0x1b   : > { %s276_s10 = scalar_lea.vmem %s1233_s2, %s1100_s29 }
  0x1c PF: > { %v290_v1 = vld [vmem:[%s1092_s16] sm:$0xff]  ;;  %v291_v2 = vld [vmem:[%s1092_s16 + $0x8] sm:$0xff]  ;;  %vm313_vm1 = vcmask 523264   ;;  %v992_v3 = vmov 0.0|0.0   ;;  %vm993_vm3 = vmmov 0   ;;  %v994_v6 = vmov 0.0  }
  0x1d   : > { %782 = vmatprep.subr.bf16.mxu0 %v992_v3  ;;  %v783_v4 = vpack.c.bf16 %v291_v2, %v290_v1  ;;  %vm1112_vm2 = vmpackc.low %vm313_vm1, %vm313_vm1  ;;  %814 = vmatprep.subr.bf16.mxu1 %v992_v3  ;;  %v292_v7 = vld [vmem:[%s1092_s16 + $0x10] sm:$0xff]  ;;  %v293_v8 = vld [vmem:[%s1092_s16 + $0x18] sm:$0xff]  ;;  %p673_p13 = scmp.ne.s32.totalorder %s973_s20, 1 }
  0x1e   : > { %744 = vmatprep.mubr.msk.f32.mxu0 %vm993_vm3, %v994_v6  ;;  %779 = vmatprep.mubr.msk.f32.mxu1 %vm993_vm3, %v994_v6  ;;  %v445_v9 = vld [vmem:[%s1097_s27] sm:$0xff]  ;;  %v446_v10 = vld [vmem:[%s1097_s27 + $0x8] sm:$0xff]  ;;  %v787_v11 = vpack.c.bf16 %v293_v8, %v292_v7  ;;  %v296_v16 = vld [vmem:[%s1092_s16 + $0x30] sm:$0xff] }
  0x1f   : > { %785 = vmatpush3.bf16.xpose.msk.msra.mxu0 %vm1112_vm2, %v783_v4  ;;  %v815_v12 = vpack.c.bf16 %v446_v10, %v445_v9  ;;  %v294_v13 = vld [vmem:[%s1092_s16 + $0x20] sm:$0xff]  ;;  %v295_v14 = vld [vmem:[%s1092_s16 + $0x28] sm:$0xff]  ;;  %v297_v17 = vld [vmem:[%s1092_s16 + $0x38] sm:$0xff] }
  0x20   : > { %786 = vmatprep.subr.bf16.mxu0 %v992_v3  ;;  %v791_v15 = vpack.c.bf16 %v295_v14, %v294_v13  ;;  %v795_v18 = vpack.c.bf16 %v297_v17, %v296_v16  ;;  %v298_v19 = vld [vmem:[%s1092_s16 + $0x40] sm:$0xff]  ;;  %v299_v20 = vld [vmem:[%s1092_s16 + $0x48] sm:$0xff]  ;;  %v300_v22 = vld [vmem:[%s1092_s16 + $0x50] sm:$0xff] }
  0x21   : > { %816 = vmatpush3.bf16.msra.mxu1 %v815_v12  ;;  %v799_v21 = vpack.c.bf16 %v299_v20, %v298_v19  ;;  %v301_v23 = vld [vmem:[%s1092_s16 + $0x58] sm:$0xff]  ;;  %v302_v25 = vld [vmem:[%s1092_s16 + $0x60] sm:$0xff]  ;;  %v303_v26 = vld [vmem:[%s1092_s16 + $0x68] sm:$0xff] }
  0x22   : > { %817 = vmatprep.subr.bf16.mxu1 %v992_v3  ;;  %v803_v24 = vpack.c.bf16 %v301_v23, %v300_v22  ;;  %v807_v27 = vpack.c.bf16 %v303_v26, %v302_v25  ;;  %v304_v28 = vld [vmem:[%s1092_s16 + $0x70] sm:$0xff]  ;;  %v305_v29 = vld [vmem:[%s1092_s16 + $0x78] sm:$0xff]  ;;  %v289_v31 = vld [vmem:[%s1087_s12] sm:$0xff] }
  0x23   : > { %v811_v30 = vpack.c.bf16 %v305_v29, %v304_v28  ;;  %v447_v32 = vld [vmem:[%s1097_s27 + $0x10] sm:$0xff]  ;;  %v448_v33 = vld [vmem:[%s1097_s27 + $0x18] sm:$0xff]  ;;  %v449_v35 = vld [vmem:[%s1097_s27 + $0x20] sm:$0xff] }
  0x24   : > { %v818_v34 = vpack.c.bf16 %v448_v33, %v447_v32  ;;  %v450_v36 = vld [vmem:[%s1097_s27 + $0x28] sm:$0xff]  ;;  %v451_v38 = vld [vmem:[%s1097_s27 + $0x30] sm:$0xff]  ;;  %v452_v39 = vld [vmem:[%s1097_s27 + $0x38] sm:$0xff] }
  0x25   : > { %v821_v37 = vpack.c.bf16 %v450_v36, %v449_v35  ;;  %v824_v40 = vpack.c.bf16 %v452_v39, %v451_v38  ;;  %v453_v41 = vld [vmem:[%s1097_s27 + $0x40] sm:$0xff]  ;;  %v454_v42 = vld [vmem:[%s1097_s27 + $0x48] sm:$0xff]  ;;  %v455_v44 = vld [vmem:[%s1097_s27 + $0x50] sm:$0xff] }
  0x26   : > { %819 = vmatpush3.bf16.msra.mxu1 %v818_v34  ;;  %v827_v43 = vpack.c.bf16 %v454_v42, %v453_v41  ;;  %v456_v45 = vld [vmem:[%s1097_s27 + $0x58] sm:$0xff]  ;;  %v457_v47 = vld [vmem:[%s1097_s27 + $0x60] sm:$0xff]  ;;  %v458_v48 = vld [vmem:[%s1097_s27 + $0x68] sm:$0xff] }
  0x27   : > { %789 = vmatpush3.bf16.xpose.msk.msra.mxu0 %vm1112_vm2, %v787_v11  ;;  %820 = vmatprep.subr.bf16.mxu1 %v992_v3  ;;  %v830_v46 = vpack.c.bf16 %v456_v45, %v455_v44  ;;  %v833_v49 = vpack.c.bf16 %v458_v48, %v457_v47  ;;  %v459_v50 = vld [vmem:[%s1097_s27 + $0x70] sm:$0xff]  ;;  %v460_v51 = vld [vmem:[%s1097_s27 + $0x78] sm:$0xff]  ;;  %v655_v53 = vld [vmem:[%s276_s10] ss:$0 sm:$0xff] }
  0x28   : > { %790 = vmatprep.subr.bf16.mxu0 %v992_v3  ;;  %v836_v52 = vpack.c.bf16 %v460_v51, %v459_v50  ;;  %v444_v2 = vld [vmem:[#allocation2] sm:$0xff] }
  0x29   : > { %v674_v7 = vld [vmem:[%s1235_s4] ss:$0 sm:$0xff] (!%p673_p13) }
  0x2a   : > { %822 = vmatpush3.bf16.msra.mxu1 %v821_v37 }
  0x2b   : > { %823 = vmatprep.subr.bf16.mxu1 %v992_v3 }
  0x2e   : > { %825 = vmatpush3.bf16.msra.mxu1 %v824_v40 }
  0x2f   : > { %793 = vmatpush3.bf16.xpose.msk.msra.mxu0 %vm1112_vm2, %v791_v15  ;;  %826 = vmatprep.subr.bf16.mxu1 %v992_v3 }
  0x30   : > { %794 = vmatprep.subr.bf16.mxu0 %v992_v3 }
  0x32   : > { %828 = vmatpush3.bf16.msra.mxu1 %v827_v43 }
  0x33   : > { %829 = vmatprep.subr.bf16.mxu1 %v992_v3 }
  0x36   : > { %831 = vmatpush3.bf16.msra.mxu1 %v830_v46 }
  0x37   : > { %797 = vmatpush3.bf16.xpose.msk.msra.mxu0 %vm1112_vm2, %v795_v18  ;;  %832 = vmatprep.subr.bf16.mxu1 %v992_v3 }
  0x38   : > { %798 = vmatprep.subr.bf16.mxu0 %v992_v3 }
  0x3a   : > { %834 = vmatpush3.bf16.msra.mxu1 %v833_v49 }
  0x3b   : > { %835 = vmatprep.subr.bf16.mxu1 %v992_v3 }
  0x3e   : > { %837 = vmatpush3.bf16.msra.mxu1 %v836_v52 }
  0x3f   : > { %801 = vmatpush3.bf16.xpose.msk.msra.mxu0 %vm1112_vm2, %v799_v21 }
  0x40   : > { %802 = vmatprep.subr.bf16.mxu0 %v992_v3 }
  0x47   : > { %805 = vmatpush3.bf16.xpose.msk.msra.mxu0 %vm1112_vm2, %v803_v24 }
  0x48   : > { %806 = vmatprep.subr.bf16.mxu0 %v992_v3 }
  0x4f   : > { %809 = vmatpush3.bf16.xpose.msk.msra.mxu0 %vm1112_vm2, %v807_v27 }
  0x50   : > { %810 = vmatprep.subr.bf16.mxu0 %v992_v3 }
  0x57   : > { %813 = vmatpush3.bf16.xpose.msk.msra.mxu0 %vm1112_vm2, %v811_v30 }
  0x5e   : > { %745 = vmatmul.mubr.msk.f32.vlgmr.msra.gmra.mrb[0].mxu0 %vm313_vm1, %v289_v31 }
 0x131   : > { %v431_v54 = vpop.f32.mrb[0].mxu0 }
 0x132   : > { %v432_v55 = vadd.f32 %v655_v53, %v431_v54  ;;  %v746_v56 = vpop.f32.mrb[1].mxu0 }
 0x134   : > { %v436_v57 = vmul.f32 %v432_v55, %v432_v55  ;;  %v435_v63 = vmul.f32 0.5, %v432_v55 }
 0x136   : > { %v437_v58 = vmul.f32 %v436_v57, %v432_v55 }
 0x138   : > { %v438_v59 = vmul.f32 0.044715, %v437_v58 }
 0x13a   : > { %v439_v60 = vadd.f32 %v438_v59, %v432_v55 }
 0x13c   : > { %v440_v61 = vmul.f32 0.7978846, %v439_v60 }
 0x13e   : > { %901 = vtanh.f32 %v440_v61 }
 0x148   : > { %v902_v62 = vpop.eup %901 }
 0x149   : > { %v442_v0 = vadd.f32 1.0, %v902_v62 }
 0x14b   : > { %v443_v1 = vmul.f32 %v442_v0, %v435_v63 }
 0x14d   : > { %780 = vmatmul.mubr.f32.vlgmr.msra.gmra.mrb[0].mxu1 %v443_v1 }
 0x21d   : > { %536 = sbr.rel (%p673_p13) target bundleno = 558 (0x22e), region = 48 }
 0x220   : > { %v527_v3 = vpop.f32.mrb[0].mxu1 }
 0x221   : > { %v531_v4 = vadd.f32 %v527_v3, %v444_v2  ;;  %v781_v5 = vpop.f32.mrb[1].mxu1 }
 0x223   : > { %532 = vst.msk [vmem:[#allocation2] sm:$0xff] %vm313_vm1, %v531_v4 }
 0x22a   : > { %v537_v6 = vld [vmem:[#allocation2] sm:$0xff] }
 0x22b   : > { %v545_v8 = vadd.f32 %v674_v7, %v537_v6 }
 0x22d   : > { %546 = vst.msk [vmem:[#allocation3] sm:$0xff] %vm313_vm1, %v545_v8 }
 0x22e PF: > { %s675_s13 = sshll.u32 %s977_s21, 7  ;;  %s995_s17 = smov [#allocation3]  }
 0x22f   : > { %s554_s16 = scalar_lea.hbm %s1236_s5, %s675_s13  ;;  %s556_s18 = sshll.u32 %s995_s17, 4  ;;  %s557_s18 = int_to_ptr.vmem [resolvable:$true] %s556_s18 }
 0x230   : > { %s903_s20 = scalar_lea.vmem %s557_s18, 128  ;;  %p910_p3 = scmp.lt.s32.totalorder %s557_s18, %s557_s18 }
 0x231   : > { %p904_p0 = scmp.ne.s32.totalorder %s557_s18, %s903_s20  ;;  %p911_p4 = scmp.lt.s32.totalorder %s903_s20, %s903_s20 }
 0x233   : > { %p905_p1 = pnand %p904_p0, %p1068_p6  ;;  %p912_p5 = por %p911_p4, %p910_p3 }
 0x235   : > { %p906_p2 = pneg %p905_p1 }
 0x237   : > { %p913_p7 = pnand %p912_p5, %p906_p2 }
 0x239   : > { %916 = shalt.err (!%p913_p7)
}
 0x23a   : > { %s917_s27 = scalar_lea.hbm %s554_s16, 128  ;;  %s921_s30 = scalar_lea.hbm %s1236_s5, 256 }
 0x23b   : > { %p918_p8 = scmp.ne.s32.totalorder %s554_s16, %s917_s27  ;;  %p922_p11 = scmp.lt.u32.totalorder %s554_s16, %s1236_s5 }
 0x23c   : > { %p923_p12 = scmp.lt.u32.totalorder %s921_s30, %s917_s27  ;;  %p925_p0 = scmp.lt.u32.totalorder %s917_s27, %s554_s16 }
 0x23d   : > { %p919_p9 = pnand %p918_p8, %p1068_p6 }
 0x23e   : > { %p924_p13 = por %p923_p12, %p922_p11 }
 0x23f   : > { %p920_p10 = pneg %p919_p9 }
 0x240   : > { %p926_p1 = por %p925_p0, %p924_p13 }
 0x242   : > { %p927_p2 = pnand %p926_p1, %p920_p10 }
 0x244   : > { %930 = shalt.err (!%p927_p2)
}
 0x245   : > { %838 = dma.vmem_to_hbm [thread:$0]  (%p1068_p6), %s557_s18, 128, %s554_s16, [#allocation4]  }
 0x246   : > { %960 = dma.done.wait (%p1068_p6), [#allocation4], 128  }
 0x247   : > { %962 = vsyncadd (%p1068_p6), [#allocation4], 4294967168 }
 0x248 PF: > { %s16_s24 = sadd.s32 1, %s989_s24   ;;  %s1240_s18 = smov %s969_s19 }
 0x249   : > { %p13_p3 = scmp.ge.s32.totalorder %s16_s24, 6   ;;  %s1241_s19 = smov %s1078_s6 }
 0x24a   : > { %s1242_s20 = smov %s981_s22  ;;  %s1243_s21 = smov %s985_s23 }
 0x24b   : > { %s1244_s22 = smov %s1247_s25  ;;  %s1245_s23 = smov %s1251_s26 }
 0x24c   :  { %15 = sbr.rel (!%p13_p3) target bundleno = 4 (0x4), region = 85 }
 0x253   :  { %569 = vsyncpa [#allocation4], 1 }
 0x254   :  { %571 = vsyncpa [#allocation4 + $0x1], 1 }

// kernel: tpu_custom_call.1
= control target key start
LH: loop header
LB: loop body
LE: loop exit
PB: predicated region body
PF: predicated region fallthrough
CT: control target
= control target key end

     0   :  { %10 = vsyncpa [#allocation4], 0  ;;  %s1317_s0 = inlined_call_operand.vmem [shape: f32[16,64], index: 0, kind: input, shape index: {}]   ;;  %s1318_s1 = inlined_call_operand.vmem [shape: f32[256,64], index: 1, kind: input, shape index: {}]   ;;  %s1319_s2 = inlined_call_operand.vmem [shape: f32[1,256], index: 2, kind: input, shape index: {}]   ;;  %s1320_s3 = inlined_call_operand.vmem [shape: f32[256,64], index: 3, kind: input, shape index: {}]   ;;  %s1321_s4 = inlined_call_operand.vmem [shape: f32[1,64], index: 4, kind: input, shape index: {}]   ;;  %s1322_s5 = inlined_call_operand.hbm [shape: f32[16,64], index: 5, kind: output, shape index: {}]  }
   0x1   :  { %12 = vsyncpa [#allocation4 + $0x1], 0  ;;  %s1075_s18 = smov 0   ;;  %s1077_s19 = smov 0  }
   0x2   :  { %s1079_s20 = smov 0   ;;  %s1081_s21 = smov 0  }
   0x3   :  { %s1083_s22 = smov 0   ;;  %s1085_s23 = smov 0  }
   0x4   :  { %s1087_s24 = smov 0   ;;  %s1089_s25 = smov 0  }
   0x5 LB: > { %1327 = sst [smem:[#allocation6_spill]] %s1030_s23  ;;  %s671_s26 = sadd.s32 4294967295, %s1038_s25   ;;  %s1038_s25 = sphi %s1089_s25, %s18_s25   ;;  %s1034_s24 = sphi %s1087_s24, %s1339_s24   ;;  %s1030_s23 = sphi %s1085_s23, %s1338_s23   ;;  %s1026_s22 = sphi %s1083_s22, %s1337_s22   ;;  %s1022_s21 = sphi %s1081_s21, %s1336_s21   ;;  %s1018_s20 = sphi %s1079_s20, %s1342_s20   ;;  %s1014_s19 = sphi %s1077_s19, %s1341_s19   ;;  %s1010_s18 = sphi %s1075_s18, %s1340_s18  }
   0x6   : > { %1328 = sst [smem:[#allocation7_spill]] %s1034_s24  ;;  %s672_s27 = sadd.s32 4294967294, %s1038_s25  }
   0x7   : > { %s27_s28 = sadd.s32 1, %s1030_s23  ;;  %s30_s29 = sadd.s32 1, %s1034_s24 }
   0x8   : > { %p28_p0 = scmp.ge.s32.totalorder %s27_s28, 2  ;;  %p172_p1 = scmp.ne.s32.totalorder %s1018_s20, %s1014_s19 }
   0x9   : > { %p173_p2 = scmp.eq.s32.totalorder %s671_s26, 3  ;;  %p178_p4 = scmp.ne.s32.totalorder %s1014_s19, %s1010_s18 }
   0xa   : > { %s1344_s28 = smov (%p28_p0, %s27_s28), 0  ;;  %s1346_s29 = smov (!%p28_p0, %s30_s29), %s1034_s24 }
   0xb   : > { %1329 = sst [smem:[#allocation8_spill]] %s1344_s28  ;;  %p1124_p3 = por %p173_p2, %p172_p1 }
   0xc   : > { %p32_p5 = scmp.ge.s32.totalorder %s1346_s29, 2  ;;  %p179_p6 = scmp.eq.s32.totalorder %s672_s27, 3 }
   0xd   : > { %p675_p7 = scmp.ge.s32.totalorder %s1038_s25, 1  ;;  %p231_p8 = scmp.lt.s32.totalorder %s1038_s25, 5 }
   0xe   : > { %s1348_s29 = smov (%p32_p5, %s1346_s29), 0  ;;  %p1134_p9 = por %p179_p6, %p178_p4 }
   0xf   : > { %1331 = sst [smem:[#allocation9_spill]] %s1348_s29  ;;  %p232_p10 = pnand %p675_p7, %p231_p8 }
  0x10   : > { %s159_s7 = ssub.s32 %s1034_s24, %s1348_s29  ;;  %s162_s8 = sadd.s32 1, %s1018_s20 }
  0x11   : > { %p160_p11 = scmp.eq.s32.totalorder %s159_s7, 0  ;;  %235 = sbr.rel (%p232_p10) target bundleno = 587 (0x24b), region = 40 }
  0x12   : > { %s1323_s10 = sand.u32 (!%p232_p10), 1, %s1014_s19   ;;  %p271_p12 = scmp.lt.s32.totalorder (!%p232_p10), %s1026_s22, 1 }
  0x13   : > { %s1142_s9 = scalar_select %p160_p11, %s1018_s20, %s162_s8  }
  0x14   : > { %s1148_s11 = sshll.u32 (!%p232_p10), %s1323_s10, 3  ;;  %s678_s12 = sshll.u32 (!%p232_p10), %s1022_s21, 4 }
  0x15   : > { %p276_p13 = scmp.lt.s32.totalorder (!%p232_p10), %s678_s12, 31  ;;  %p281_p0 = scmp.lt.s32.totalorder (!%p232_p10), %s1022_s21, 1 }
  0x16   : > { %p682_p1 = scmp.ne.s32.totalorder (!%p232_p10), %s1022_s21, 0 }
  0x18   : > { %s272_s13 = scalar_select %p271_p12, %s1026_s22, 1 }
  0x19   : > { %s1350_s12 = smov (!%p276_p13, %s678_s12), 31  ;;  %293 = sbr.rel (%p682_p1) target bundleno = 32 (0x20), region = 44 }
  0x1a   : > { %s677_s14 = sshll.u32 %s272_s13, 3  ;;  %s679_s26 = sshll.u32 %s1350_s12, 3  ;;  %vm294_vm0 = vcmask (!%p682_p1), 523264   ;;  %v1040_v0 = vmov (!%p682_p1), 0.0  }
  0x1b   : > { %s1156_s17 = scalar_lea.vmem %s1317_s0, %s677_s14  ;;  %s1161_s8 = scalar_lea.vmem %s1318_s1, %s679_s26  ;;  %295 = vst.msk [vmem:[#allocation2] sm:$0xff] (!%p682_p1), %vm294_vm0, %v1040_v0 }
  0x1c   : > { %s1166_s28 = scalar_lea.vmem %s1320_s3, %s679_s26  ;;  %s270_s14 = scalar_lea.vmem [#allocation3], %s1148_s11 }
  0x1d   : > { %s1169_s24 = scalar_select %p281_p0, %s1022_s21, 1 }
  0x1f   : > { %s283_s15 = scalar_lea.vmem %s1319_s2, %s1169_s24 }
  0x20 PF: > { %v297_v1 = vld [vmem:[%s1161_s8] sm:$0xff]  ;;  %v298_v2 = vld [vmem:[%s1161_s8 + $0x8] sm:$0xff]  ;;  %vm320_vm1 = vcmask 523264   ;;  %v1041_v3 = vmov 0.0|0.0   ;;  %vm1042_vm3 = vmmov 0   ;;  %v1043_v6 = vmov 0.0  }
  0x21   : > { %811 = vmatprep.subr.bf16.mxu0 %v1041_v3  ;;  %v812_v4 = vpack.c.bf16 %v298_v2, %v297_v1  ;;  %vm1182_vm2 = vmpackc.low %vm320_vm1, %vm320_vm1  ;;  %843 = vmatprep.subr.bf16.mxu1 %v1041_v3  ;;  %v299_v7 = vld [vmem:[%s1161_s8 + $0x10] sm:$0xff]  ;;  %v300_v8 = vld [vmem:[%s1161_s8 + $0x18] sm:$0xff]  ;;  %p701_p2 = scmp.ne.s32.totalorder %s1022_s21, 1 }
  0x22   : > { %773 = vmatprep.mubr.msk.f32.mxu0 %vm1042_vm3, %v1043_v6  ;;  %808 = vmatprep.mubr.msk.f32.mxu1 %vm1042_vm3, %v1043_v6  ;;  %v452_v9 = vld [vmem:[%s1166_s28] sm:$0xff]  ;;  %v453_v10 = vld [vmem:[%s1166_s28 + $0x8] sm:$0xff]  ;;  %v816_v11 = vpack.c.bf16 %v300_v8, %v299_v7  ;;  %v303_v16 = vld [vmem:[%s1161_s8 + $0x30] sm:$0xff] }
  0x23   : > { %814 = vmatpush3.bf16.xpose.msk.msra.mxu0 %vm1182_vm2, %v812_v4  ;;  %v844_v12 = vpack.c.bf16 %v453_v10, %v452_v9  ;;  %v301_v13 = vld [vmem:[%s1161_s8 + $0x20] sm:$0xff]  ;;  %v302_v14 = vld [vmem:[%s1161_s8 + $0x28] sm:$0xff]  ;;  %v304_v17 = vld [vmem:[%s1161_s8 + $0x38] sm:$0xff] }
  0x24   : > { %815 = vmatprep.subr.bf16.mxu0 %v1041_v3  ;;  %v820_v15 = vpack.c.bf16 %v302_v14, %v301_v13  ;;  %v824_v18 = vpack.c.bf16 %v304_v17, %v303_v16  ;;  %v305_v19 = vld [vmem:[%s1161_s8 + $0x40] sm:$0xff]  ;;  %v306_v20 = vld [vmem:[%s1161_s8 + $0x48] sm:$0xff]  ;;  %v307_v22 = vld [vmem:[%s1161_s8 + $0x50] sm:$0xff] }
  0x25   : > { %845 = vmatpush3.bf16.msra.mxu1 %v844_v12  ;;  %v828_v21 = vpack.c.bf16 %v306_v20, %v305_v19  ;;  %v308_v23 = vld [vmem:[%s1161_s8 + $0x58] sm:$0xff]  ;;  %v309_v25 = vld [vmem:[%s1161_s8 + $0x60] sm:$0xff]  ;;  %v310_v26 = vld [vmem:[%s1161_s8 + $0x68] sm:$0xff] }
  0x26   : > { %846 = vmatprep.subr.bf16.mxu1 %v1041_v3  ;;  %v832_v24 = vpack.c.bf16 %v308_v23, %v307_v22  ;;  %v836_v27 = vpack.c.bf16 %v310_v26, %v309_v25  ;;  %v311_v28 = vld [vmem:[%s1161_s8 + $0x70] sm:$0xff]  ;;  %v312_v29 = vld [vmem:[%s1161_s8 + $0x78] sm:$0xff]  ;;  %v296_v31 = vld [vmem:[%s1156_s17] sm:$0xff] }
  0x27   : > { %v840_v30 = vpack.c.bf16 %v312_v29, %v311_v28  ;;  %v454_v32 = vld [vmem:[%s1166_s28 + $0x10] sm:$0xff]  ;;  %v455_v33 = vld [vmem:[%s1166_s28 + $0x18] sm:$0xff]  ;;  %v456_v35 = vld [vmem:[%s1166_s28 + $0x20] sm:$0xff] }
  0x28   : > { %v847_v34 = vpack.c.bf16 %v455_v33, %v454_v32  ;;  %v457_v36 = vld [vmem:[%s1166_s28 + $0x28] sm:$0xff]  ;;  %v458_v38 = vld [vmem:[%s1166_s28 + $0x30] sm:$0xff]  ;;  %v459_v39 = vld [vmem:[%s1166_s28 + $0x38] sm:$0xff] }
  0x29   : > { %v850_v37 = vpack.c.bf16 %v457_v36, %v456_v35  ;;  %v853_v40 = vpack.c.bf16 %v459_v39, %v458_v38  ;;  %v460_v41 = vld [vmem:[%s1166_s28 + $0x40] sm:$0xff]  ;;  %v461_v42 = vld [vmem:[%s1166_s28 + $0x48] sm:$0xff]  ;;  %v462_v44 = vld [vmem:[%s1166_s28 + $0x50] sm:$0xff] }
  0x2a   : > { %848 = vmatpush3.bf16.msra.mxu1 %v847_v34  ;;  %v856_v43 = vpack.c.bf16 %v461_v42, %v460_v41  ;;  %v463_v45 = vld [vmem:[%s1166_s28 + $0x58] sm:$0xff]  ;;  %v464_v47 = vld [vmem:[%s1166_s28 + $0x60] sm:$0xff]  ;;  %v465_v48 = vld [vmem:[%s1166_s28 + $0x68] sm:$0xff] }
  0x2b   : > { %818 = vmatpush3.bf16.xpose.msk.msra.mxu0 %vm1182_vm2, %v816_v11  ;;  %849 = vmatprep.subr.bf16.mxu1 %v1041_v3  ;;  %v859_v46 = vpack.c.bf16 %v463_v45, %v462_v44  ;;  %v862_v49 = vpack.c.bf16 %v465_v48, %v464_v47  ;;  %v466_v50 = vld [vmem:[%s1166_s28 + $0x70] sm:$0xff]  ;;  %v467_v51 = vld [vmem:[%s1166_s28 + $0x78] sm:$0xff]  ;;  %v683_v53 = vld [vmem:[%s283_s15] ss:$0 sm:$0xff] }
  0x2c   : > { %819 = vmatprep.subr.bf16.mxu0 %v1041_v3  ;;  %v865_v52 = vpack.c.bf16 %v467_v51, %v466_v50  ;;  %v451_v2 = vld [vmem:[#allocation2] sm:$0xff] }
  0x2d   : > { %v702_v7 = vld [vmem:[%s1321_s4] ss:$0 sm:$0xff] (!%p701_p2) }
  0x2e   : > { %851 = vmatpush3.bf16.msra.mxu1 %v850_v37 }
  0x2f   : > { %852 = vmatprep.subr.bf16.mxu1 %v1041_v3 }
  0x32   : > { %854 = vmatpush3.bf16.msra.mxu1 %v853_v40 }
  0x33   : > { %822 = vmatpush3.bf16.xpose.msk.msra.mxu0 %vm1182_vm2, %v820_v15  ;;  %855 = vmatprep.subr.bf16.mxu1 %v1041_v3 }
  0x34   : > { %823 = vmatprep.subr.bf16.mxu0 %v1041_v3 }
  0x36   : > { %857 = vmatpush3.bf16.msra.mxu1 %v856_v43 }
  0x37   : > { %858 = vmatprep.subr.bf16.mxu1 %v1041_v3 }
  0x3a   : > { %860 = vmatpush3.bf16.msra.mxu1 %v859_v46 }
  0x3b   : > { %826 = vmatpush3.bf16.xpose.msk.msra.mxu0 %vm1182_vm2, %v824_v18  ;;  %861 = vmatprep.subr.bf16.mxu1 %v1041_v3 }
  0x3c   : > { %827 = vmatprep.subr.bf16.mxu0 %v1041_v3 }
  0x3e   : > { %863 = vmatpush3.bf16.msra.mxu1 %v862_v49 }
  0x3f   : > { %864 = vmatprep.subr.bf16.mxu1 %v1041_v3 }
  0x42   : > { %866 = vmatpush3.bf16.msra.mxu1 %v865_v52 }
  0x43   : > { %830 = vmatpush3.bf16.xpose.msk.msra.mxu0 %vm1182_vm2, %v828_v21 }
  0x44   : > { %831 = vmatprep.subr.bf16.mxu0 %v1041_v3 }
  0x4b   : > { %834 = vmatpush3.bf16.xpose.msk.msra.mxu0 %vm1182_vm2, %v832_v24 }
  0x4c   : > { %835 = vmatprep.subr.bf16.mxu0 %v1041_v3 }
  0x53   : > { %838 = vmatpush3.bf16.xpose.msk.msra.mxu0 %vm1182_vm2, %v836_v27 }
  0x54   : > { %839 = vmatprep.subr.bf16.mxu0 %v1041_v3 }
  0x5b   : > { %842 = vmatpush3.bf16.xpose.msk.msra.mxu0 %vm1182_vm2, %v840_v30 }
  0x62   : > { %774 = vmatmul.mubr.msk.f32.vlgmr.msra.gmra.mrb[0].mxu0 %vm320_vm1, %v296_v31 }
 0x135   : > { %v438_v54 = vpop.f32.mrb[0].mxu0 }
 0x136   : > { %v439_v55 = vadd.f32 %v683_v53, %v438_v54  ;;  %v775_v56 = vpop.f32.mrb[1].mxu0 }
 0x138   : > { %v443_v57 = vmul.f32 %v439_v55, %v439_v55  ;;  %v442_v63 = vmul.f32 0.5, %v439_v55 }
 0x13a   : > { %v444_v58 = vmul.f32 %v443_v57, %v439_v55 }
 0x13c   : > { %v445_v59 = vmul.f32 0.044715, %v444_v58 }
 0x13e   : > { %v446_v60 = vadd.f32 %v445_v59, %v439_v55 }
 0x140   : > { %v447_v61 = vmul.f32 0.7978846, %v446_v60 }
 0x142   : > { %942 = vtanh.f32 %v447_v61 }
 0x14c   : > { %v943_v62 = vpop.eup %942 }
 0x14d   : > { %v449_v0 = vadd.f32 1.0, %v943_v62 }
 0x14f   : > { %v450_v1 = vmul.f32 %v449_v0, %v442_v63 }
 0x151   : > { %809 = vmatmul.mubr.f32.vlgmr.msra.gmra.mrb[0].mxu1 %v450_v1 }
 0x221   : > { %543 = sbr.rel (%p701_p2) target bundleno = 562 (0x232), region = 48 }
 0x224   : > { %v534_v3 = vpop.f32.mrb[0].mxu1 }
 0x225   : > { %v538_v4 = vadd.f32 %v534_v3, %v451_v2  ;;  %v810_v5 = vpop.f32.mrb[1].mxu1 }
 0x227   : > { %539 = vst.msk [vmem:[#allocation2] sm:$0xff] %vm320_vm1, %v538_v4 }
 0x22e   : > { %v544_v6 = vld [vmem:[#allocation2] sm:$0xff] }
 0x22f   : > { %v552_v8 = vadd.f32 %v702_v7, %v544_v6 }
 0x231   : > { %553 = vst.msk [vmem:[%s270_s14] sm:$0xff] %vm320_vm1, %v552_v8 }
 0x232 PF: > { %s704_s10 = sshll.u32 %s1026_s22, 7  ;;  %s568_s17 = sshll.u32 %s270_s14, 4  ;;  %s569_s17 = int_to_ptr.vmem [resolvable:$true] %s568_s17 }
 0x233   : > { %s1266_s21 = scalar_lea.hbm %s1322_s5, %s704_s10  ;;  %s1335_s26 = sand.u32 1, %s1014_s19  }
 0x234   : > { %s555_s27 = scalar_lea.sflag [#allocation4], %s1335_s26  ;;  %s944_s7 = scalar_lea.vmem %s569_s17, 128 }
 0x235   : > { %p945_p4 = scmp.ne.s32.totalorder %s569_s17, %s944_s7  ;;  %s1044_s8 = smov [#allocation3]  }
 0x236   : > { %s948_s13 = sshll.u32 %s1044_s8, 4  ;;  %s949_s13 = int_to_ptr.vmem [resolvable:$false] %s948_s13 }
 0x237   : > { %p946_p5 = pnand %p945_p4, %p1124_p3  ;;  %s950_s15 = scalar_lea.vmem %s949_s13, 256 }
 0x238   : > { %p951_p7 = scmp.lt.s32.totalorder %s569_s17, %s949_s13  ;;  %p952_p8 = scmp.lt.s32.totalorder %s950_s15, %s944_s7 }
 0x239   : > { %p947_p6 = pneg %p946_p5 }
 0x23a   : > { %p953_p10 = por %p952_p8, %p951_p7 }
 0x23c   : > { %p954_p11 = pnand %p953_p10, %p947_p6 }
 0x23e   : > { %957 = shalt.err (!%p954_p11)
}
 0x23f   : > { %s958_s22 = scalar_lea.hbm %s1266_s21, 128  ;;  %s962_s23 = scalar_lea.hbm %s1322_s5, 256 }
 0x240   : > { %p959_p12 = scmp.ne.s32.totalorder %s1266_s21, %s958_s22  ;;  %p963_p1 = scmp.lt.u32.totalorder %s1266_s21, %s1322_s5 }
 0x241   : > { %p964_p2 = scmp.lt.u32.totalorder %s962_s23, %s958_s22  ;;  %p966_p5 = scmp.lt.u32.totalorder %s958_s22, %s1266_s21 }
 0x242   : > { %p960_p13 = pnand %p959_p12, %p1124_p3 }
 0x243   : > { %p965_p4 = por %p964_p2, %p963_p1 }
 0x244   : > { %p961_p0 = pneg %p960_p13 }
 0x245   : > { %p967_p6 = por %p966_p5, %p965_p4 }
 0x247   : > { %p968_p7 = pnand %p967_p6, %p961_p0 }
 0x249   : > { %971 = shalt.err (!%p968_p7)
}
 0x24a   : > { %867 = dma.vmem_to_hbm [thread:$0]  (%p1124_p3), %s569_s17, 128, %s1266_s21, %s555_s27  }
 0x24b PF: > { %p873_p8 = scmp.ge.s32.totalorder %s1038_s25, 2  ;;  %s580_s28 = sand.u32 1, %s1010_s18  }
 0x24c   : > { %s581_s10 = scalar_lea.sflag [#allocation4], %s580_s28 }
 0x24d   : > { %p870_p10 = pnand %p873_p8, %p1134_p9 }
 0x24f   : > { %1005 = dma.done.wait (!%p870_p10), %s581_s10, 128  }
 0x250   : > { %1007 = vsyncadd (!%p870_p10), %s581_s10, 4294967168  ;;  %s18_s25 = sadd.s32 1, %s1038_s25   ;;  %s1336_s21 = sld [smem:[#allocation6_spill]] }
 0x251   : > { %p15_p11 = scmp.ge.s32.totalorder %s18_s25, 6   ;;  %s1337_s22 = sld [smem:[#allocation7_spill]] }
 0x252   : > { %s1338_s23 = sld [smem:[#allocation8_spill]]  ;;  %s1339_s24 = sld [smem:[#allocation9_spill]] }
 0x253   : > { %s1340_s18 = smov %s1014_s19  ;;  %s1341_s19 = smov %s1018_s20 }
 0x254   : > { %s1342_s20 = smov %s1142_s9  ;;  %17 = sbr.rel (!%p15_p11) target bundleno = 5 (0x5), region = 92 }
 0x25b   :  { %586 = vsyncpa [#allocation4], 1 }
 0x25c   :  { %588 = vsyncpa [#allocation4 + $0x1], 1 }

</bundles_post_ra>
